<compile_context>
chip_gen: v6e
topology: v6e:2x2x1
jax: 0.10.0
libtpu: 0.0.40
codegen_flags: <defaults>
</compile_context>

<pallas_src>
import functools

import jax
import jax.numpy as jnp
from jax import lax
from jax.experimental import pallas as pl
from jax.experimental.pallas import tpu as pltpu


_MAX_TILE = 32768          # bounds per-step trace / unroll size
_ACC_WIDTH = 512           # lane width of the resident accumulators


def _vmem_budget():
    """Generation-aware (per-step working-set budget, scoped VMEM limit)."""
    vmem = 128 * 1024 * 1024
    try:
        info = pltpu.get_tpu_info()
        vmem = int(getattr(info, "vmem_capacity_bytes", vmem)) or vmem
    except Exception:
        pass
    budget = min(vmem // 4, 40 * 1024 * 1024)   # v5e/v6e: ~32 MiB, v7x: ~16 MiB
    limit = min(vmem // 2, 64 * 1024 * 1024)    # v5e/v6e: 64 MiB,  v7x: 32 MiB
    return budget, limit


def _pick_tile(c, logit_itemsize, budget):
    """Lane-tile size T (multiple of 128) for the flattened H*W axis.

    The per-pixel VMEM model counts sublane padding: the (1,T) targets tile
    pads to 32 sublane-bytes/pixel regardless of dtype, the logits block pads C
    to a multiple of 8 (f32) / 16 (bf16) rows, and the in-body f32 (C,T)
    temporaries pad C to a multiple of 8 (budgeted generously in case the
    clean/tail branches do not share VMEM).
    """
    sub_in = 8 * max(1, 4 // logit_itemsize)
    c_in = -(-c // sub_in) * sub_in
    c_f32 = -(-c // 8) * 8
    per_pix = (2 * c_in * logit_itemsize     # logits double-buffer
               + 2 * 32                      # targets double-buffer (sublane padded)
               + 12 * c_f32 * 4)             # live f32 (C,T) temporaries
    t = int(budget) // per_pix
    t = max(128, (t // 128) * 128)
    return min(t, _MAX_TILE)


def _lane_block_sum(a, width):
    """(R, k*width) -> (R, width): sum lane-aligned blocks.

    Static slices at multiples of 128 lanes are pure vreg selection (no
    relayout), so this is just a tree of VPU adds — no per-step XLU reduce.
    """
    k = a.shape[-1] // width
    parts = [a[:, i * width:(i + 1) * width] for i in range(k)]
    while len(parts) > 1:
        half = len(parts) // 2
        parts = ([parts[i] + parts[i + half] for i in range(half)]
                 + parts[2 * half:])
    return parts[0]


def _loss_kernel(x_ref, t_ref, inter_ref, union_ref, xsum_ref, lse_ref, *,
                 c, hw, t_block, w_acc, tiles_per_split, clean_tiles, has_tail):
    p = pl.program_id(2)

    @pl.when(p == 0)
    def _init():
        inter_ref[...] = jnp.zeros_like(inter_ref)
        union_ref[...] = jnp.zeros_like(union_ref)
        xsum_ref[...] = jnp.zeros_like(xsum_ref)
        lse_ref[...] = jnp.zeros_like(lse_ref)

    # Global pixel-tile index: the leading grid axis splits the pixel range
    # across TensorCores when the batch axis alone cannot.
    p_glob = pl.program_id(0) * tiles_per_split + p

    def accumulate(x, tgt, valid):
        # x: (C, T) f32 logits; tgt: (1, T) int32; valid: (1, T) f32 or None.
        ch = lax.broadcasted_iota(jnp.int32, (c, t_block), 0)
        one_hot = (ch == tgt).astype(jnp.float32)                  # (C, T)

        # Numerically stable softmax / log-sum-exp over the class axis.
        # TODO(synk): for large C (>= ~64) route the class-axis sums through
        # the idle MXU (dot-with-ones) instead of the XLU sublane-reduce tree.
        m = jnp.max(x, axis=0, keepdims=True)                      # (1, T)
        e = jnp.exp(x - m)                                         # (C, T)
        s = jnp.sum(e, axis=0, keepdims=True)                      # (1, T)
        lse = m + jnp.log(s)                                       # (1, T)
        inv = pl.reciprocal(s, approx=True)                        # (1, T)
        if valid is not None:
            inv = inv * valid    # probs pre-masked -> union needs no extra pass
            lse = lse * valid    # padded pixels contribute exactly 0 to CE
        probs = e * inv                                            # (C, T)

        # Lane-dense partial sums; final cross-lane reduction happens in JAX.
        inter_ref[0, 0] += _lane_block_sum(probs * one_hot, w_acc)
        union_ref[0, 0] += _lane_block_sum(probs + one_hot, w_acc)
        xsum_ref[0, 0] += _lane_block_sum(one_hot * x, w_acc)
        lse_ref[0, 0] += _lane_block_sum(lse, w_acc)

    if has_tail:
        @pl.when(p_glob < clean_tiles)
        def _interior():    # fast path: every column of the tile is a real pixel
            accumulate(x_ref[0].astype(jnp.float32),
                       t_ref[0].astype(jnp.int32), None)

        @pl.when(p_glob >= clean_tiles)
        def _ragged_tail():  # ragged / overflow tile: mask undefined columns
            pix = (p_glob * t_block
                   + lax.broadcasted_iota(jnp.int32, (1, t_block), 1))
            vb = pix < hw
            x = jnp.where(vb, x_ref[0].astype(jnp.float32), 0.0)
            tgt = jnp.where(vb, t_ref[0].astype(jnp.int32), c)
            accumulate(x, tgt, vb.astype(jnp.float32))
    else:
        accumulate(x_ref[0].astype(jnp.float32),
                   t_ref[0].astype(jnp.int32), None)


def combined_segmentation_loss(logits, targets, *, ce_weight=0.5,
                               dice_weight=0.5, smooth=1.0,
                               max_pixels_per_step=None):
    """logits: (N, C, H, W) float (any dtype); targets: (N, H, W) int -> scalar."""
    N, C, H, W = logits.shape
    HW = H * W

    budget, vmem_limit = _vmem_budget()
    T = _pick_tile(C, jnp.dtype(logits.dtype).itemsize, budget)
    if max_pixels_per_step is not None:
        T = min(T, max(128, (int(max_pixels_per_step) // 128) * 128))

    x = logits.reshape(N, C, HW)              # native dtype: no f32 upcast in HBM
    tgt_dtype = jnp.int8 if C <= 127 else jnp.int32
    t = targets.reshape(N, 1, HW).astype(tgt_dtype)

    if HW % 128 == 0:
        T = min(T, HW)
    elif HW <= T:
        T = HW                                # one full-width tile (block == dim)
    else:
        # TODO(synk): rare path (large H*W not a multiple of 128); pads <=127
        # columns, which costs one extra HBM copy of the logits.
        hw_pad = -(-HW // 128) * 128
        x = jnp.pad(x, ((0, 0), (0, 0), (0, hw_pad - HW)))
        t = jnp.pad(t, ((0, 0), (0, 0), (0, hw_pad - HW)))
        T = min(T, hw_pad)
    if T > _ACC_WIDTH:
        T -= T % _ACC_WIDTH                   # accumulator width must divide T
    w_acc = min(_ACC_WIDTH, T)

    num_tiles = pl.cdiv(HW, T)
    clean_tiles = HW // T                     # tiles with no padded columns

    # Megacore balance: if the batch axis alone cannot keep 2 TensorCores busy
    # (odd N, notably N == 1), a leading parallel axis splits the pixel-tile
    # range in two; the partial sums are combined outside the kernel.
    S = 2 if (N % 2 == 1 and num_tiles >= 2) else 1
    tps = -(-num_tiles // S)
    has_tail = (S * tps) > clean_tiles

    last = num_tiles - 1
    x_map = lambda s, b, p: (b, 0, jnp.minimum(s * tps + p, last))
    t_map = lambda s, b, p: (b, 0, jnp.minimum(s * tps + p, last))
    acc_map = lambda s, b, p: (s, b, 0, 0)

    kernel = functools.partial(
        _loss_kernel, c=C, hw=HW, t_block=T, w_acc=w_acc,
        tiles_per_split=tps, clean_tiles=clean_tiles, has_tail=has_tail)

    inter_p, union_p, xsum_p, lse_p = pl.pallas_call(
        kernel,
        out_shape=(
            jax.ShapeDtypeStruct((S, N, C, w_acc), jnp.float32),   # intersection
            jax.ShapeDtypeStruct((S, N, C, w_acc), jnp.float32),   # union
            jax.ShapeDtypeStruct((S, N, C, w_acc), jnp.float32),   # sum one_hot*x
            jax.ShapeDtypeStruct((S, N, 1, w_acc), jnp.float32),   # sum valid*lse
        ),
        grid_spec=pltpu.PrefetchScalarGridSpec(
            num_scalar_prefetch=0,
            grid=(S, N, tps),
            in_specs=[
                pl.BlockSpec((1, C, T), x_map),
                pl.BlockSpec((1, 1, T), t_map),
            ],
            out_specs=[
                pl.BlockSpec((1, 1, C, w_acc), acc_map),
                pl.BlockSpec((1, 1, C, w_acc), acc_map),
                pl.BlockSpec((1, 1, C, w_acc), acc_map),
                pl.BlockSpec((1, 1, 1, w_acc), acc_map),
            ],
        ),
        compiler_params=pltpu.CompilerParams(
            dimension_semantics=("parallel", "parallel", "arbitrary"),
            vmem_limit_bytes=int(vmem_limit),
        ),
    )(x, t)

    inter = jnp.sum(inter_p, axis=(0, 3))            # (N, C)
    union = jnp.sum(union_p, axis=(0, 3))            # (N, C)
    ce_mean = (jnp.sum(lse_p) - jnp.sum(xsum_p)) / jnp.float32(N * HW)
    dice = (2.0 * inter + smooth) / (union + smooth)
    dice_loss = 1.0 - jnp.mean(dice)
    return jnp.float32(ce_weight) * ce_mean + jnp.float32(dice_weight) * dice_loss


def _reference_loss(logits, targets, ce_weight=0.5, dice_weight=0.5, smooth=1.0):
    x = logits.astype(jnp.float32)
    C = x.shape[1]
    lse = jax.scipy.special.logsumexp(x, axis=1, keepdims=True)
    logp = x - lse
    one_hot = jax.nn.one_hot(targets, C, axis=1, dtype=jnp.float32)
    ce = -jnp.mean(jnp.sum(logp * one_hot, axis=1))
    p = jax.nn.softmax(x, axis=1)
    inter = jnp.sum(p * one_hot, axis=(2, 3))
    union = jnp.sum(p, axis=(2, 3)) + jnp.sum(one_hot, axis=(2, 3))
    dice = (2.0 * inter + smooth) / (union + smooth)
    dice_loss = 1.0 - jnp.mean(dice)
    return ce_weight * ce + dice_weight * dice_loss


if __name__ == "__main__":
    key = jax.random.PRNGKey(0)
    k1, k2, k3, k4, k5, k6 = jax.random.split(key, 6)

    # Test 1: f32 logits, lane-aligned spatial size (single clean tile).
    N, C, H, W = 2, 4, 16, 16
    logits = jax.random.normal(k1, (N, C, H, W), dtype=jnp.float32)
    targets = jax.random.randint(k2, (N, H, W), 0, C, dtype=jnp.int32)
    loss = jax.block_until_ready(combined_segmentation_loss(logits, targets))
    ref = jax.block_until_ready(_reference_loss(logits, targets))
    assert jnp.abs(loss - ref) < 2e-3, (loss, ref)

    # Test 2: bf16 logits, C not a multiple of 8, H*W < 128 (full-dim tile),
    # int8 targets path.
    N2, C2, H2, W2 = 2, 5, 10, 12
    logits2 = jax.random.normal(k3, (N2, C2, H2, W2),
                                dtype=jnp.float32).astype(jnp.bfloat16)
    targets2 = jax.random.randint(k4, (N2, H2, W2), 0, C2, dtype=jnp.int32)
    loss2 = jax.block_until_ready(combined_segmentation_loss(logits2, targets2))
    ref2 = jax.block_until_ready(_reference_loss(logits2, targets2))
    assert jnp.abs(loss2 - ref2) < 5e-3, (loss2, ref2)

    # Test 3: N == 1 (odd -> pixel-split parallel axis), multi-tile grid with a
    # ragged masked tail and a fully-out-of-range overflow tile.
    N3, C3, H3, W3 = 1, 3, 16, 40
    logits3 = jax.random.normal(k5, (N3, C3, H3, W3), dtype=jnp.float32)
    targets3 = jax.random.randint(k6, (N3, H3, W3), 0, C3, dtype=jnp.int32)
    loss3 = jax.block_until_ready(
        combined_segmentation_loss(logits3, targets3, max_pixels_per_step=256))
    ref3 = jax.block_until_ready(_reference_loss(logits3, targets3))
    assert jnp.abs(loss3 - ref3) < 2e-3, (loss3, ref3)

    print("KERNEL_OK")
</pallas_src>

<mosaic_0001>
module attributes {stable_mosaic.version = 11 : i64} {
  func.func @_loss_kernel(%arg0: i32, %arg1: i32, %arg2: i32, %arg3: memref<1x4x256xf32, #tpu.memory_space<vmem>>, %arg4: memref<1x1x256xi8, #tpu.memory_space<vmem>>, %arg5: memref<1x1x4x256xf32, #tpu.memory_space<vmem>>, %arg6: memref<1x1x4x256xf32, #tpu.memory_space<vmem>>, %arg7: memref<1x1x4x256xf32, #tpu.memory_space<vmem>>, %arg8: memref<1x1x1x256xf32, #tpu.memory_space<vmem>>) attributes {dimension_semantics = [#tpu.dimension_semantics<parallel>, #tpu.dimension_semantics<parallel>, #tpu.dimension_semantics<arbitrary>], iteration_bounds = array<i64: 1, 2, 1>, scalar_prefetch = 0 : i64, scratch_operands = 0 : i64, tpu.core_type = #tpu.core_type<tc>, window_params = [{transform_indices = @transform_0, window_bounds = array<i64: 1, 4, 256>}, {transform_indices = @transform_1, window_bounds = array<i64: 1, 1, 256>}, {transform_indices = @transform_2, window_bounds = array<i64: 1, 1, 4, 256>}, {transform_indices = @transform_3, window_bounds = array<i64: 1, 1, 4, 256>}, {transform_indices = @transform_4, window_bounds = array<i64: 1, 1, 4, 256>}, {transform_indices = @transform_5, window_bounds = array<i64: 1, 1, 1, 256>}]} {
    %c0_i32 = arith.constant 0 : i32
    %0 = arith.cmpi eq, %arg2, %c0_i32 : i32
    %1 = arith.extui %0 : i1 to i32
    %c0_i32_0 = arith.constant 0 : i32
    %2 = arith.cmpi ne, %1, %c0_i32_0 : i32
    scf.if %2 {
      %cst_39 = arith.constant 0.000000e+00 : f32
      %52 = vector.broadcast %cst_39 : f32 to vector<1x1x4x256xf32>
      %c0_40 = arith.constant 0 : index
      %c0_41 = arith.constant 0 : index
      %c0_42 = arith.constant 0 : index
      %c0_43 = arith.constant 0 : index
      %53 = vector.load %arg5[%c0_40, %c0_41, %c0_42, %c0_43] : memref<1x1x4x256xf32, #tpu.memory_space<vmem>>, vector<1x1x4x256xf32>
      tpu.vector_store %arg5[%c0_40, %c0_41, %c0_42, %c0_43], %52 {strides = array<i32>} : memref<1x1x4x256xf32, #tpu.memory_space<vmem>>, vector<1x1x4x256xf32>,
      %cst_44 = arith.constant 0.000000e+00 : f32
      %54 = vector.broadcast %cst_44 : f32 to vector<1x1x4x256xf32>
      %c0_45 = arith.constant 0 : index
      %c0_46 = arith.constant 0 : index
      %c0_47 = arith.constant 0 : index
      %c0_48 = arith.constant 0 : index
      %55 = vector.load %arg6[%c0_45, %c0_46, %c0_47, %c0_48] : memref<1x1x4x256xf32, #tpu.memory_space<vmem>>, vector<1x1x4x256xf32>
      tpu.vector_store %arg6[%c0_45, %c0_46, %c0_47, %c0_48], %54 {strides = array<i32>} : memref<1x1x4x256xf32, #tpu.memory_space<vmem>>, vector<1x1x4x256xf32>,
      %cst_49 = arith.constant 0.000000e+00 : f32
      %56 = vector.broadcast %cst_49 : f32 to vector<1x1x4x256xf32>
      %c0_50 = arith.constant 0 : index
      %c0_51 = arith.constant 0 : index
      %c0_52 = arith.constant 0 : index
      %c0_53 = arith.constant 0 : index
      %57 = vector.load %arg7[%c0_50, %c0_51, %c0_52, %c0_53] : memref<1x1x4x256xf32, #tpu.memory_space<vmem>>, vector<1x1x4x256xf32>
      tpu.vector_store %arg7[%c0_50, %c0_51, %c0_52, %c0_53], %56 {strides = array<i32>} : memref<1x1x4x256xf32, #tpu.memory_space<vmem>>, vector<1x1x4x256xf32>,
      %cst_54 = arith.constant 0.000000e+00 : f32
      %58 = vector.broadcast %cst_54 : f32 to vector<1x1x1x256xf32>
      %c0_55 = arith.constant 0 : index
      %c0_56 = arith.constant 0 : index
      %c0_57 = arith.constant 0 : index
      %c0_58 = arith.constant 0 : index
      %59 = vector.load %arg8[%c0_55, %c0_56, %c0_57, %c0_58] : memref<1x1x1x256xf32, #tpu.memory_space<vmem>>, vector<1x1x1x256xf32>
      tpu.vector_store %arg8[%c0_55, %c0_56, %c0_57, %c0_58], %58 {strides = array<i32>} : memref<1x1x1x256xf32, #tpu.memory_space<vmem>>, vector<1x1x1x256xf32>,
    } else {
    }
    %c0 = arith.constant 0 : index
    %c0_1 = arith.constant 0 : index
    %c0_2 = arith.constant 0 : index
    %3 = vector.load %arg3[%c0, %c0_1, %c0_2] : memref<1x4x256xf32, #tpu.memory_space<vmem>>, vector<1x4x256xf32>
    %4 = vector.shape_cast %3 : vector<1x4x256xf32> to vector<4x256xf32>
    %c0_3 = arith.constant 0 : index
    %c0_4 = arith.constant 0 : index
    %c0_5 = arith.constant 0 : index
    %5 = vector.load %arg4[%c0_3, %c0_4, %c0_5] : memref<1x1x256xi8, #tpu.memory_space<vmem>>, vector<1x1x256xi8>
    %6 = vector.shape_cast %5 : vector<1x1x256xi8> to vector<1x256xi8>
    %7 = arith.extsi %6 : vector<1x256xi8> to vector<1x256xi32>
    %8 = tpu.iota {dimensions = array<i32: 0>} : vector<4x256xi32>
    %9 = vector.broadcast %7 : vector<1x256xi32> to vector<4x256xi32>
    %10 = arith.cmpi eq, %8, %9 : vector<4x256xi32>
    %11 = arith.extui %10 : vector<4x256xi1> to vector<4x256xi32>
    %12 = arith.sitofp %11 : vector<4x256xi32> to vector<4x256xf32>
    %cst = arith.constant dense<0xFF800000> : vector<256xf32>
    %13 = vector.multi_reduction <maximumf>, %4, %cst [0] : vector<4x256xf32> to vector<256xf32>
    %14 = vector.shape_cast %13 : vector<256xf32> to vector<1x256xf32>
    %15 = vector.broadcast %14 : vector<1x256xf32> to vector<4x256xf32>
    %16 = arith.subf %4, %15 : vector<4x256xf32>
    %17 = math.exp %16 : vector<4x256xf32>
    %cst_6 = arith.constant dense<0.000000e+00> : vector<256xf32>
    %18 = vector.multi_reduction <add>, %17, %cst_6 [0] : vector<4x256xf32> to vector<256xf32>
    %19 = vector.shape_cast %18 : vector<256xf32> to vector<1x256xf32>
    %20 = math.log %19 : vector<1x256xf32>
    %21 = arith.addf %14, %20 : vector<1x256xf32>
    %22 = tpu.reciprocal %19 {approx = true} : vector<1x256xf32> -> vector<1x256xf32>
    %23 = vector.broadcast %22 : vector<1x256xf32> to vector<4x256xf32>
    %24 = arith.mulf %17, %23 : vector<4x256xf32>
    %c0_7 = arith.constant 0 : index
    %c0_8 = arith.constant 0 : index
    %c0_9 = arith.constant 0 : index
    %c0_10 = arith.constant 0 : index
    %25 = vector.load %arg5[%c0_7, %c0_8, %c0_9, %c0_10] : memref<1x1x4x256xf32, #tpu.memory_space<vmem>>, vector<1x1x4x256xf32>
    %26 = vector.shape_cast %25 : vector<1x1x4x256xf32> to vector<4x256xf32>
    %27 = arith.mulf %24, %12 : vector<4x256xf32>
    %28 = arith.addf %26, %27 : vector<4x256xf32>
    %c0_11 = arith.constant 0 : index
    %c0_12 = arith.constant 0 : index
    %c0_13 = arith.constant 0 : index
    %c0_14 = arith.constant 0 : index
    %29 = vector.load %arg5[%c0_11, %c0_12, %c0_13, %c0_14] : memref<1x1x4x256xf32, #tpu.memory_space<vmem>>, vector<1x1x4x256xf32>
    %30 = vector.shape_cast %29 : vector<1x1x4x256xf32> to vector<4x256xf32>
    %31 = vector.shape_cast %28 : vector<4x256xf32> to vector<1x1x4x256xf32>
    tpu.vector_store %arg5[%c0_11, %c0_12, %c0_13, %c0_14], %31 {strides = array<i32>} : memref<1x1x4x256xf32, #tpu.memory_space<vmem>>, vector<1x1x4x256xf32>,
    %c0_15 = arith.constant 0 : index
    %c0_16 = arith.constant 0 : index
    %c0_17 = arith.constant 0 : index
    %c0_18 = arith.constant 0 : index
    %32 = vector.load %arg6[%c0_15, %c0_16, %c0_17, %c0_18] : memref<1x1x4x256xf32, #tpu.memory_space<vmem>>, vector<1x1x4x256xf32>
    %33 = vector.shape_cast %32 : vector<1x1x4x256xf32> to vector<4x256xf32>
    %34 = arith.addf %24, %12 : vector<4x256xf32>
    %35 = arith.addf %33, %34 : vector<4x256xf32>
    %c0_19 = arith.constant 0 : index
    %c0_20 = arith.constant 0 : index
    %c0_21 = arith.constant 0 : index
    %c0_22 = arith.constant 0 : index
    %36 = vector.load %arg6[%c0_19, %c0_20, %c0_21, %c0_22] : memref<1x1x4x256xf32, #tpu.memory_space<vmem>>, vector<1x1x4x256xf32>
    %37 = vector.shape_cast %36 : vector<1x1x4x256xf32> to vector<4x256xf32>
    %38 = vector.shape_cast %35 : vector<4x256xf32> to vector<1x1x4x256xf32>
    tpu.vector_store %arg6[%c0_19, %c0_20, %c0_21, %c0_22], %38 {strides = array<i32>} : memref<1x1x4x256xf32, #tpu.memory_space<vmem>>, vector<1x1x4x256xf32>,
    %c0_23 = arith.constant 0 : index
    %c0_24 = arith.constant 0 : index
    %c0_25 = arith.constant 0 : index
    %c0_26 = arith.constant 0 : index
    %39 = vector.load %arg7[%c0_23, %c0_24, %c0_25, %c0_26] : memref<1x1x4x256xf32, #tpu.memory_space<vmem>>, vector<1x1x4x256xf32>
    %40 = vector.shape_cast %39 : vector<1x1x4x256xf32> to vector<4x256xf32>
    %41 = arith.mulf %12, %4 : vector<4x256xf32>
    %42 = arith.addf %40, %41 : vector<4x256xf32>
    %c0_27 = arith.constant 0 : index
    %c0_28 = arith.constant 0 : index
    %c0_29 = arith.constant 0 : index
    %c0_30 = arith.constant 0 : index
    %43 = vector.load %arg7[%c0_27, %c0_28, %c0_29, %c0_30] : memref<1x1x4x256xf32, #tpu.memory_space<vmem>>, vector<1x1x4x256xf32>
    %44 = vector.shape_cast %43 : vector<1x1x4x256xf32> to vector<4x256xf32>
    %45 = vector.shape_cast %42 : vector<4x256xf32> to vector<1x1x4x256xf32>
    tpu.vector_store %arg7[%c0_27, %c0_28, %c0_29, %c0_30], %45 {strides = array<i32>} : memref<1x1x4x256xf32, #tpu.memory_space<vmem>>, vector<1x1x4x256xf32>,
    %c0_31 = arith.constant 0 : index
    %c0_32 = arith.constant 0 : index
    %c0_33 = arith.constant 0 : index
    %c0_34 = arith.constant 0 : index
    %46 = vector.load %arg8[%c0_31, %c0_32, %c0_33, %c0_34] : memref<1x1x1x256xf32, #tpu.memory_space<vmem>>, vector<1x1x1x256xf32>
    %47 = vector.shape_cast %46 : vector<1x1x1x256xf32> to vector<1x256xf32>
    %48 = arith.addf %47, %21 : vector<1x256xf32>
    %c0_35 = arith.constant 0 : index
    %c0_36 = arith.constant 0 : index
    %c0_37 = arith.constant 0 : index
    %c0_38 = arith.constant 0 : index
    %49 = vector.load %arg8[%c0_35, %c0_36, %c0_37, %c0_38] : memref<1x1x1x256xf32, #tpu.memory_space<vmem>>, vector<1x1x1x256xf32>
    %50 = vector.shape_cast %49 : vector<1x1x1x256xf32> to vector<1x256xf32>
    %51 = vector.shape_cast %48 : vector<1x256xf32> to vector<1x1x1x256xf32>
    tpu.vector_store %arg8[%c0_35, %c0_36, %c0_37, %c0_38], %51 {strides = array<i32>} : memref<1x1x1x256xf32, #tpu.memory_space<vmem>>, vector<1x1x1x256xf32>,
    return
  }
  func.func @transform_0(%arg0: i32, %arg1: i32, %arg2: i32) -> (i32, i32, i32) {
    %c1_i32 = arith.constant 1 : i32
    %0 = arith.muli %arg0, %c1_i32 : i32
    %1 = arith.addi %0, %arg2 : i32
    %c0_i32 = arith.constant 0 : i32
    %2 = arith.minsi %1, %c0_i32 : i32
    %c0_i32_0 = arith.constant 0 : i32
    %c0_i32_1 = arith.constant 0 : i32
    return %arg1, %c0_i32_0, %2 : i32, i32, i32
  }
  func.func @transform_1(%arg0: i32, %arg1: i32, %arg2: i32) -> (i32, i32, i32) {
    %c1_i32 = arith.constant 1 : i32
    %0 = arith.muli %arg0, %c1_i32 : i32
    %1 = arith.addi %0, %arg2 : i32
    %c0_i32 = arith.constant 0 : i32
    %2 = arith.minsi %1, %c0_i32 : i32
    %c0_i32_0 = arith.constant 0 : i32
    %c0_i32_1 = arith.constant 0 : i32
    return %arg1, %c0_i32_0, %2 : i32, i32, i32
  }
  func.func @transform_2(%arg0: i32, %arg1: i32, %arg2: i32) -> (i32, i32, i32, i32) {
    %c0_i32 = arith.constant 0 : i32
    %c0_i32_0 = arith.constant 0 : i32
    %c0_i32_1 = arith.constant 0 : i32
    return %arg0, %arg1, %c0_i32, %c0_i32_0 : i32, i32, i32, i32
  }
  func.func @transform_3(%arg0: i32, %arg1: i32, %arg2: i32) -> (i32, i32, i32, i32) {
    %c0_i32 = arith.constant 0 : i32
    %c0_i32_0 = arith.constant 0 : i32
    %c0_i32_1 = arith.constant 0 : i32
    return %arg0, %arg1, %c0_i32, %c0_i32_0 : i32, i32, i32, i32
  }
  func.func @transform_4(%arg0: i32, %arg1: i32, %arg2: i32) -> (i32, i32, i32, i32) {
    %c0_i32 = arith.constant 0 : i32
    %c0_i32_0 = arith.constant 0 : i32
    %c0_i32_1 = arith.constant 0 : i32
    return %arg0, %arg1, %c0_i32, %c0_i32_0 : i32, i32, i32, i32
  }
  func.func @transform_5(%arg0: i32, %arg1: i32, %arg2: i32) -> (i32, i32, i32, i32) {
    %c0_i32 = arith.constant 0 : i32
    %c0_i32_0 = arith.constant 0 : i32
    %c0_i32_1 = arith.constant 0 : i32
    return %arg0, %arg1, %c0_i32, %c0_i32_0 : i32, i32, i32, i32
  }
}

</mosaic_0001>

<bundles_post_ra>
// kernel: tpu_custom_call.1
= control target key start
LH: loop header
LB: loop body
LE: loop exit
PB: predicated region body
PF: predicated region fallthrough
CT: control target
= control target key end

     0   :  { %s1432_s0 = inlined_call_operand.hbm [shape: f32[2,4,256], index: 0, kind: input, shape index: {}]   ;;  %s1433_s1 = inlined_call_operand.vmem [shape: s8[2,1,256], index: 1, kind: input, shape index: {}]   ;;  %s1434_s2 = inlined_call_operand.hbm [shape: f32[1,2,4,256], index: 2, kind: output, shape index: {0}]   ;;  %s1435_s3 = inlined_call_operand.hbm [shape: f32[1,2,4,256], index: 3, kind: output, shape index: {1}]   ;;  %s1436_s4 = inlined_call_operand.hbm [shape: f32[1,2,4,256], index: 4, kind: output, shape index: {2}]   ;;  %s1437_s5 = inlined_call_operand.hbm [shape: f32[1,2,1,256], index: 5, kind: output, shape index: {3}]  }
   0x1   :  { %1441 = sst [smem:[#allocation18_spill]] %s1432_s0 }
   0x2   :  { %1442 = sst [smem:[#allocation19_spill]] %s1433_s1 }
   0x3   :  { %11 = vsyncpa [#allocation3], 0 }
   0x4   :  { %13 = vsyncpa [#allocation3 + $0x1], 0 }
   0x5   :  { %14 = vsyncpa [#allocation4], 0 }
   0x6   :  { %16 = vsyncpa [#allocation4 + $0x1], 0 }
   0x7   :  { %17 = vsyncpa [#allocation7], 0 }
   0x8   :  { %19 = vsyncpa [#allocation7 + $0x1], 0 }
   0x9   :  { %20 = vsyncpa [#allocation10], 0 }
   0xa   :  { %22 = vsyncpa [#allocation10 + $0x1], 0  ;;  %s1149_s18 = smov 0   ;;  %s1151_s19 = smov 0  }
   0xb   :  { %s1153_s20 = smov 0   ;;  %s1155_s21 = smov 0  }
   0xc   :  { %s1157_s22 = smov 0   ;;  %s1159_s23 = smov 0  }
   0xd LB: > { %1443 = sst [smem:[#allocation15_spill]] %s1106_s22  ;;  %s1180_s24 = sadd.s32 4294967295, %s1110_s23   ;;  %s1110_s23 = sphi %s1159_s23, %s28_s23   ;;  %s1106_s22 = sphi %s1157_s22, %s1460_s22   ;;  %s1102_s21 = sphi %s1155_s21, %s1459_s21   ;;  %s1098_s20 = sphi %s1153_s20, %s1463_s20   ;;  %s1094_s19 = sphi %s1151_s19, %s1462_s19   ;;  %s1090_s18 = sphi %s1149_s18, %s1461_s18  }
   0xe   : > { %s1438_s25 = sadd.s32 4294967294, %s1110_s23   ;;  %s43_s26 = sadd.s32 1, %s1106_s22 }
   0xf   : > { %s62_s27 = sadd.s32 1, %s1098_s20  ;;  %p45_p0 = scmp.ge.s32.totalorder %s43_s26, 2 }
  0x10   : > { %p69_p1 = scmp.ne.s32.totalorder %s1098_s20, %s1094_s19  ;;  %p70_p2 = scmp.eq.s32.totalorder %s1110_s23, 0 }
  0x11   : > { %p75_p3 = scmp.ne.s32.totalorder %s1094_s19, %s1090_s18  ;;  %s1465_s26 = smov (%p45_p0, %s43_s26), 0 }
  0x12   : > { %1444 = sst [smem:[#allocation16_spill]] %s1465_s26  ;;  %p1192_p4 = por %p70_p2, %p69_p1 }
  0x13   : > { %p76_p5 = scmp.eq.s32.totalorder %s1180_s24, 0  ;;  %s57_s29 = ssub.s32 %s1106_s22, %s1465_s26 }
  0x14   : > { %p135_p6 = scmp.eq.s32.totalorder %s1180_s24, 1  ;;  %p60_p7 = scmp.eq.s32.totalorder %s57_s29, 0 }
  0x15   : > { %p1200_p8 = por %p76_p5, %p75_p3  ;;  %p141_p10 = scmp.eq.s32.totalorder %s1438_s25, 1 }
  0x16   : > { %p1204_p9 = por %p135_p6, %p69_p1  ;;  %p853_p13 = scmp.lt.s32.totalorder %s1110_s23, 2 }
  0x17   : > { %s1211_s7 = scalar_select %p60_p7, %s1098_s20, %s62_s27  }
  0x18   : > { %p1213_p11 = por %p141_p10, %p75_p3  ;;  %s245_s9 = sand.u32 1, %s1098_s20  }
  0x19   : > { %1448 = sst [smem:[#allocation17_spill]] %s1211_s7  ;;  %s795_s10 = sshll.u32 %s245_s9, 3 }
  0x1a   : > { %s1449_s8 = scalar_select %p1213_p11, 1, 0 }
  0x1b   : > { %s821_s11 = sshll.u32 %s1106_s22, 7  ;;  %s1450_s0 = sld [smem:[#allocation18_spill]] }
  0x1c   : > { %s249_s15 = scalar_lea.vmem [#allocation2], %s795_s10  ;;  %p1226_p0 = pnand %p853_p13, %p1192_p4 }
  0x1d   : > { %s262_s16 = sshll.u32 %s249_s15, 4  ;;  %p798_p1 = scmp.ge.s32.totalorder %s1110_s23, 1  ;;  %s263_s16 = int_to_ptr.vmem [resolvable:$true] %s262_s16 }
  0x1e   : > { %p285_p2 = scmp.lt.s32.totalorder %s1110_s23, 3  ;;  %s246_s27 = scalar_lea.sflag [#allocation3], %s245_s9 }
  0x1f   : > { %p918_p3 = pneg %p1226_p0  ;;  %s929_s29 = scalar_lea.vmem %s263_s16, 128 }
  0x20   : > { %p930_p5 = scmp.ne.s32.totalorder %s263_s16, %s929_s29  ;;  %s1112_s12 = smov [#allocation2]  }
  0x21   : > { %s260_s14 = scalar_lea.hbm %s1450_s0, %s821_s11  ;;  %s934_s11 = sshll.u32 %s1112_s12, 4  ;;  %s935_s11 = int_to_ptr.vmem [resolvable:$false] %s934_s11 }
  0x22   : > { %p932_p6 = pnand %p930_p5, %p918_p3  ;;  %s936_s10 = scalar_lea.vmem %s935_s11, 256 }
  0x23   : > { %p937_p10 = scmp.lt.s32.totalorder %s263_s16, %s935_s11  ;;  %p938_p12 = scmp.lt.s32.totalorder %s936_s10, %s929_s29 }
  0x24   : > { %p933_p7 = pneg %p932_p6 }
  0x25   : > { %p939_p4 = por %p938_p12, %p937_p10 }
  0x27   : > { %p940_p13 = pnand %p939_p4, %p933_p7 }
  0x29   : > { %943 = shalt.err (!%p940_p13)
}
  0x2a   : > { %839 = dma.hbm_to_vmem [thread:$0]  (!%p1226_p0), %s260_s14, 128, %s263_s16, %s246_s27  }
  0x2b   : > { %p286_p11 = pnand %p798_p1, %p285_p2 }
  0x2c   : > { %s1241_s28 = sand.u32 (!%p286_p11), 1, %s1094_s19  }
  0x2d   : > { %289 = sbr.rel (%p286_p11) target bundleno = 207 (0xcf), region = 28  ;;  %s1244_s9 = sshll.u32 (!%p286_p11), %s1241_s28, 3 }
  0x2e   : > { %s292_s13 = scalar_lea.sflag (!%p286_p11), [#allocation3], %s1241_s28  ;;  %s295_s15 = scalar_lea.vmem (!%p286_p11), [#allocation2], %s1244_s9 }
  0x32   : > { %1073 = dma.done.wait (%p1200_p8), %s292_s13, 128  }
  0x33   : > { %1075 = vsyncadd (%p1200_p8), %s292_s13, 4294967168  ;;  %v374_v0 = vlaneseq  ;;  %s803_s14 = sshll.u32 %s1241_s28, 1  ;;  %v1113_v2 = vmov 0.0   ;;  %p356_p11 = scmp.lt.s32.totalorder %s1102_s21, 1  ;;  %vm409_vm1 = vcmask 1043456   ;;  %v379_v4 = vld [vmem:[%s295_s15] sm:$0xff] }
  0x34   : > { %s1257_s16 = scalar_lea.vmem [#allocation9], %s803_s14  ;;  %v407_v5 = vcombine.high %v379_v4, %v379_v4  ;;  %v410_v6 = vsel %vm409_vm1, %v379_v4, -inf  ;;  %s1454_s1 = sld [smem:[#allocation19_spill]]  ;;  %v1114_v52 = vmov 1966171168  }
  0x35   : > { %vm1253_vm0 = vcmp.lt.s32.totalorder %v374_v0, 256  ;;  %v1263_v3 = vshrl.u32 %v374_v0, 7  ;;  %s357_s30 = scalar_select %p356_p11, %s1102_s21, 1  ;;  %v411_v9 = vrot.slane %v410_v6, 4  ;;  %v487_v53 = vunpack.c.l.s4 %v1114_v52 }
  0x36   : > { %378 = vst.msk [vmem:[%s1257_s16] sm:$0x3] %vm1253_vm0, %v1113_v2  ;;  %v417_v11 = vsel %vm409_vm1, %v407_v5, -inf  ;;  %s340_s11 = scalar_lea.vmem [#allocation8], %s1244_s9  ;;  %s512_s13 = sand.u32 1, %s1180_s24  }
  0x37   : > { %s804_s17 = sshll.u32 %s357_s30, 1  ;;  %v386_v7 = vsub.s32 0, %v1263_v3  ;;  %v390_v8 = vsub.s32 4, %v1263_v3  ;;  %v412_v13 = vmax.f32 %v410_v6, %v411_v9  ;;  %v418_v14 = vrot.slane %v417_v11, 4  ;;  %s571_s10 = sshll.u32 %s340_s11, 4  ;;  %s1286_s10 = int_to_ptr.vmem [resolvable:$true] %s571_s10 }
  0x38   : > { %v488_v57 = vunpack.c.0.s8 %v487_v53  ;;  %s822_s15 = sshll.u32 %s1102_s21, 7  ;;  %s333_s14 = scalar_lea.vmem [#allocation6], %s1244_s9 }
  0x39   : > { %v413_v17 = vrot.slane %v412_v13, 2  ;;  %v419_v18 = vmax.f32 %v417_v11, %v418_v14  ;;  %s555_s30 = sshll.u32 %s333_s14, 4  ;;  %s1291_s29 = scalar_lea.hbm %s1435_s3, %s822_s15  ;;  %s1293_s30 = int_to_ptr.vmem [resolvable:$true] %s555_s30 }
  0x3a   : > { %s362_s12 = scalar_lea.vmem %s1454_s1, %s804_s17  ;;  %s326_s24 = scalar_lea.vmem [#allocation5], %s1244_s9 }
  0x3b   : > { %v380_v10 = vld [vmem:[%s362_s12] sm:$0x3]  ;;  %v414_v21 = vmax.f32 %v412_v13, %v413_v17  ;;  %v420_v22 = vrot.slane %v419_v18, 2  ;;  %s539_s12 = sshll.u32 %s326_s24, 4  ;;  %s587_s25 = sshll.u32 %s1257_s16, 4  ;;  %s1309_s12 = int_to_ptr.vmem [resolvable:$true] %s539_s12  ;;  %s1316_s25 = int_to_ptr.vmem [resolvable:$true] %s587_s25 }
  0x3c   : > { %v381_v12 = vunpack.c.0.s8 %v380_v10  ;;  %s1302_s26 = scalar_lea.hbm %s1434_s2, %s822_s15  ;;  %s1307_s22 = scalar_lea.hbm %s1436_s4, %s822_s15 }
  0x3d   : > { %v415_v23 = vrot.slane %v414_v21, 1  ;;  %v421_v24 = vmax.f32 %v419_v18, %v420_v22  ;;  %s1318_s0 = scalar_lea.sflag [#allocation7], %s512_s13  ;;  %s944_s1 = scalar_lea.vmem %s1293_s30, 128 }
  0x3e   : > { %v387_v15 = vrot.slane %v381_v12, %v386_v7  ;;  %v391_v16 = vrot.slane %v381_v12, %v390_v8  ;;  %p945_p8 = scmp.ne.s32.totalorder %s1293_s30, %s944_s1  ;;  %s1115_s15 = smov [#allocation6]  }
  0x3f   : > { %v416_v29 = vmax.f32 %v414_v21, %v415_v23  ;;  %v422_v30 = vrot.slane %v421_v24, 1  ;;  %s948_s17 = sshll.u32 %s1115_s15, 4  ;;  %s949_s17 = int_to_ptr.vmem [resolvable:$false] %s948_s17 }
  0x40   : > { %v395_v19 = vrot.slane %v387_v15, %v386_v7  ;;  %v399_v20 = vrot.slane %v391_v16, %v386_v7  ;;  %p946_p12 = pnand %p945_p8, %p1204_p9  ;;  %p951_p1 = scmp.lt.s32.totalorder %s1293_s30, %s949_s17 }
  0x41   : > { %v423_v32 = vmax.f32 %v421_v24, %v422_v30 }
  0x42   : > { %vm400_vm2 = vcmp.eq.s32.totalorder %v1263_v3, %v395_v19  ;;  %vm401_vm3 = vcmp.eq.s32.totalorder %v1263_v3, %v399_v20  ;;  %p947_p0 = pneg %p946_p12 }
  0x43   : > { %v805_v25 = vsel %vm400_vm2, 1.0, %v1113_v2  ;;  %v806_v26 = vsel %vm401_vm3, 1.0, %v1113_v2  ;;  %v426_v33 = vcombine.low %v416_v29, %v423_v32  ;;  %v491_v2 = vsub.s32 %v488_v57, %v1263_v3  ;;  %v482_v3 = vld [vmem:[%s1257_s16] sm:$0x3] }
  0x44   : > { %v474_v27 = vmul.f32 %v805_v25, %v379_v4  ;;  %v475_v28 = vmul.f32 %v806_v26, %v407_v5  ;;  %v464_v63 = vcombine.low %v805_v25, %v806_v26 }
  0x45   : > { %v428_v34 = vsub.f32 %v379_v4, %v426_v33 }
  0x46   : > { %v478_v31 = vcombine.low %v474_v27, %v475_v28 }
  0x47   : > { %v429_v35 = vmul.f32 1.442695, %v428_v34 }
  0x48   : > { %481 = vst [vmem:[%s340_s11] sm:$0xff] %v478_v31  ;;  %s825_s11 = sshll.u32 %s1102_s21, 5 }
  0x49   : > { %906 = vpow2.f32 %v429_v35  ;;  %s1314_s7 = scalar_lea.hbm %s1437_s5, %s825_s11 }
  0x56   : > { %v907_v36 = vpop.eup %906 }
  0x57   : > { %v432_v37 = vcombine.high %v907_v36, %v907_v36  ;;  %v434_v38 = vsel %vm409_vm1, %v907_v36, 0.0 }
  0x58   : > { %v435_v39 = vrot.slane %v434_v38, 4 }
  0x59   : > { %v441_v40 = vsel %vm409_vm1, %v432_v37, 0.0 }
  0x5a   : > { %v436_v41 = vadd.f32 %v435_v39, %v434_v38  ;;  %v442_v42 = vrot.slane %v441_v40, 4 }
  0x5c   : > { %v437_v43 = vrot.slane %v436_v41, 2  ;;  %v443_v44 = vadd.f32 %v442_v42, %v441_v40 }
  0x5e   : > { %v438_v45 = vadd.f32 %v437_v43, %v436_v41  ;;  %v444_v46 = vrot.slane %v443_v44, 2 }
  0x60   : > { %v439_v47 = vrot.slane %v438_v45, 1  ;;  %v445_v48 = vadd.f32 %v444_v46, %v443_v44 }
  0x62   : > { %v440_v49 = vadd.f32 %v439_v47, %v438_v45  ;;  %v446_v50 = vrot.slane %v445_v48, 1 }
  0x64   : > { %v447_v51 = vadd.f32 %v446_v50, %v445_v48  ;;  %908 = vlog2.f32 %v440_v49 }
  0x65   : > { %910 = vrcp.f32 %v440_v49 }
  0x66   : > { %912 = vlog2.f32 %v447_v51 }
  0x67   : > { %914 = vrcp.f32 %v447_v51 }
  0x71   : > { %v909_v54 = vpop.eup %908 }
  0x72   : > { %v911_v55 = vpop.eup %910  ;;  %v449_v56 = vmul.f32 0.6931472, %v909_v54 }
  0x73   : > { %v913_v58 = vpop.eup %912 }
  0x74   : > { %v915_v59 = vpop.eup %914  ;;  %v451_v60 = vmul.f32 0.6931472, %v913_v58  ;;  %v452_v61 = vadd.f32 %v449_v56, %v416_v29 }
  0x75   : > { %v458_v62 = vcombine.low %v911_v55, %v915_v59 }
  0x76   : > { %v453_v0 = vadd.f32 %v451_v60, %v423_v32 }
  0x77   : > { %v460_v4 = vmul.f32 %v907_v36, %v458_v62 }
  0x78   : > { %v485_v5 = vcombine.low %v452_v61, %v453_v0 }
  0x79   : > { %v470_v6 = vadd.f32 %v464_v63, %v460_v4  ;;  %v466_v7 = vmul.f32 %v464_v63, %v460_v4 }
  0x7a   : > { %v492_v8 = vrot.slane %v485_v5, %v491_v2 }
  0x7b   : > { %472 = vst [vmem:[%s333_s14] sm:$0xff] %v470_v6  ;;  %468 = vst [vmem:[%s326_s24] sm:$0xff] %v466_v7  ;;  %s950_s14 = scalar_lea.vmem %s949_s17, 256 }
  0x7c   : > { %v499_v9 = vrot.slane %v492_v8, %v491_v2  ;;  %p952_p2 = scmp.lt.s32.totalorder %s950_s14, %s944_s1 }
  0x7e   : > { %v501_v10 = vadd.f32 %v499_v9, %v482_v3  ;;  %p953_p3 = por %p952_p2, %p951_p1 }
  0x80   : > { %p954_p5 = pnand %p953_p3, %p947_p0 }
  0x82   : > { %957 = shalt.err (!%p954_p5)
}
  0x83   : > { %s958_s13 = scalar_lea.hbm %s1291_s29, 128  ;;  %s962_s27 = scalar_lea.hbm %s1435_s3, 256 }
  0x84   : > { %p959_p6 = scmp.ne.s32.totalorder %s1291_s29, %s958_s13  ;;  %p963_p4 = scmp.lt.s32.totalorder %s1291_s29, %s1435_s3 }
  0x85   : > { %p964_p13 = scmp.lt.s32.totalorder %s962_s27, %s958_s13 }
  0x86   : > { %p960_p7 = pnand %p959_p6, %p1204_p9 }
  0x87   : > { %p965_p11 = por %p964_p13, %p963_p4 }
  0x88   : > { %p961_p10 = pneg %p960_p7 }
  0x8a   : > { %p966_p8 = pnand %p965_p11, %p961_p10 }
  0x8c   : > { %969 = shalt.err (!%p966_p8)
}
  0x8d   : > { %829 = dma.vmem_to_hbm [thread:$0]  (%p1204_p9), %s1293_s30, 128, %s1291_s29, %s1318_s0  }
  0x8e   : > { %s508_s1 = scalar_lea.sflag [#allocation4], %s1241_s28  ;;  %s970_s15 = scalar_lea.vmem %s1309_s12, 128 }
  0x8f   : > { %p971_p12 = scmp.ne.s32.totalorder %s1309_s12, %s970_s15  ;;  %s1116_s17 = smov [#allocation5]  }
  0x90   : > { %s974_s14 = sshll.u32 %s1116_s17, 4  ;;  %s975_s14 = int_to_ptr.vmem [resolvable:$false] %s974_s14 }
  0x91   : > { %p972_p0 = pnand %p971_p12, %p1204_p9  ;;  %s976_s13 = scalar_lea.vmem %s975_s14, 256 }
  0x92   : > { %p977_p2 = scmp.lt.s32.totalorder %s1309_s12, %s975_s14  ;;  %p978_p3 = scmp.lt.s32.totalorder %s976_s13, %s970_s15 }
  0x93   : > { %p973_p1 = pneg %p972_p0 }
  0x94   : > { %p979_p5 = por %p978_p3, %p977_p2 }
  0x96   : > { %p980_p6 = pnand %p979_p5, %p973_p1 }
  0x98   : > { %983 = shalt.err (!%p980_p6)
}
  0x99   : > { %s984_s30 = scalar_lea.hbm %s1302_s26, 128  ;;  %s988_s11 = scalar_lea.hbm %s1434_s2, 256 }
  0x9a   : > { %p985_p7 = scmp.ne.s32.totalorder %s1302_s26, %s984_s30  ;;  %p989_p13 = scmp.lt.s32.totalorder %s1302_s26, %s1434_s2 }
  0x9b   : > { %p990_p11 = scmp.lt.s32.totalorder %s988_s11, %s984_s30 }
  0x9c   : > { %p986_p10 = pnand %p985_p7, %p1204_p9 }
  0x9d   : > { %p991_p8 = por %p990_p11, %p989_p13 }
  0x9e   : > { %p987_p4 = pneg %p986_p10 }
  0xa0   : > { %p992_p12 = pnand %p991_p8, %p987_p4 }
  0xa2   : > { %995 = shalt.err (!%p992_p12)
}
  0xa3   : > { %828 = dma.vmem_to_hbm [thread:$0]  (%p1204_p9), %s1309_s12, 128, %s1302_s26, %s508_s1   ;;  %506 = vst.msk [vmem:[%s1257_s16] sm:$0x3] %vm1253_vm0, %v501_v10 }
  0xa4   : > { %s996_s21 = scalar_lea.vmem %s1286_s10, 128  ;;  %s1117_s15 = smov [#allocation8]  }
  0xa5   : > { %p997_p0 = scmp.ne.s32.totalorder %s1286_s10, %s996_s21  ;;  %s1000_s17 = sshll.u32 %s1117_s15, 4  ;;  %s1001_s17 = int_to_ptr.vmem [resolvable:$false] %s1000_s17 }
  0xa6   : > { %s1002_s14 = scalar_lea.vmem %s1001_s17, 256  ;;  %p1003_p3 = scmp.lt.s32.totalorder %s1286_s10, %s1001_s17 }
  0xa7   : > { %p998_p1 = pnand %p997_p0, %p1204_p9  ;;  %p1004_p5 = scmp.lt.s32.totalorder %s1002_s14, %s996_s21 }
  0xa9   : > { %p999_p2 = pneg %p998_p1  ;;  %p1005_p6 = por %p1004_p5, %p1003_p3 }
  0xab   : > { %p1006_p7 = pnand %p1005_p6, %p999_p2 }
  0xad   : > { %1009 = shalt.err (!%p1006_p7)
}
  0xae   : > { %s1010_s26 = scalar_lea.hbm %s1307_s22, 128  ;;  %s1014_s1 = scalar_lea.hbm %s1436_s4, 256 }
  0xaf   : > { %p1011_p10 = scmp.ne.s32.totalorder %s1307_s22, %s1010_s26  ;;  %p1015_p11 = scmp.lt.s32.totalorder %s1307_s22, %s1436_s4 }
  0xb0   : > { %p1016_p8 = scmp.lt.s32.totalorder %s1014_s1, %s1010_s26 }
  0xb1   : > { %p1012_p4 = pnand %p1011_p10, %p1204_p9 }
  0xb2   : > { %p1017_p12 = por %p1016_p8, %p1015_p11 }
  0xb3   : > { %p1013_p13 = pneg %p1012_p4 }
  0xb5   : > { %p1018_p0 = pnand %p1017_p12, %p1013_p13 }
  0xb7   : > { %1021 = shalt.err (!%p1018_p0)
}
  0xb8   : > { %830 = dma.vmem_to_hbm [thread:$0]  (%p1204_p9), %s1286_s10, 128, %s1307_s22, %s1318_s0  }
  0xb9   : > { %s523_s29 = scalar_lea.sflag [#allocation10], %s1241_s28  ;;  %s1022_s24 = scalar_lea.vmem %s1316_s25, 32 }
  0xba   : > { %p1023_p1 = scmp.ne.s32.totalorder %s1316_s25, %s1022_s24  ;;  %s1118_s11 = smov [#allocation9]  }
  0xbb   : > { %s1026_s27 = sshll.u32 %s1118_s11, 4  ;;  %s1027_s27 = int_to_ptr.vmem [resolvable:$false] %s1026_s27 }
  0xbc   : > { %p1024_p2 = pnand %p1023_p1, %p1204_p9  ;;  %s1028_s9 = scalar_lea.vmem %s1027_s27, 64 }
  0xbd   : > { %p1029_p5 = scmp.lt.s32.totalorder %s1316_s25, %s1027_s27  ;;  %p1030_p6 = scmp.lt.s32.totalorder %s1028_s9, %s1022_s24 }
  0xbe   : > { %p1025_p3 = pneg %p1024_p2 }
  0xbf   : > { %p1031_p7 = por %p1030_p6, %p1029_p5 }
  0xc1   : > { %p1032_p10 = pnand %p1031_p7, %p1025_p3 }
  0xc3   : > { %1035 = shalt.err (!%p1032_p10)
}
  0xc4   : > { %s1036_s22 = scalar_lea.hbm %s1314_s7, 32  ;;  %s1040_s0 = scalar_lea.hbm %s1437_s5, 64 }
  0xc5   : > { %p1037_p4 = scmp.ne.s32.totalorder %s1314_s7, %s1036_s22  ;;  %p1041_p8 = scmp.lt.s32.totalorder %s1314_s7, %s1437_s5 }
  0xc6   : > { %p1042_p12 = scmp.lt.s32.totalorder %s1040_s0, %s1036_s22 }
  0xc7   : > { %p1038_p13 = pnand %p1037_p4, %p1204_p9 }
  0xc8   : > { %p1043_p0 = por %p1042_p12, %p1041_p8 }
  0xc9   : > { %p1039_p11 = pneg %p1038_p13 }
  0xcb   : > { %p1044_p1 = pnand %p1043_p0, %p1039_p11 }
  0xcd   : > { %1047 = shalt.err (!%p1044_p1)
}
  0xce   : > { %831 = dma.vmem_to_hbm [thread:$0]  (%p1204_p9), %s1316_s25, 32, %s1314_s7, %s523_s29  }
  0xcf PF: > { %s599_s17 = sand.u32 1, %s1090_s18   ;;  %p1455_p2 = scmp.ne.s32.totalorder %s1449_s8, 0 }
  0xd0   : > { %p1456_p3 = scmp.ge.s32.totalorder %s1110_s23, 2  ;;  %s600_s14 = scalar_lea.sflag [#allocation4], %s599_s17 }
  0xd2   : > { %p841_p5 = pnand %p1456_p3, %p1455_p2 }
  0xd4   : > { %p842_p6 = pneg %p841_p5 }
  0xd6   : > { %1077 = dma.done.wait (%p842_p6), %s600_s14, 128  }
  0xd7   : > { %1079 = vsyncadd (%p842_p6), %s600_s14, 4294967168  ;;  %s1457_s26 = sadd.s32 4294967294, %s1110_s23  }
  0xd8   : > { %s608_s16 = sand.u32 1, %s1457_s26  }
  0xd9   : > { %s609_s12 = scalar_lea.sflag [#allocation7], %s608_s16 }
  0xda   : > { %1081 = dma.done.wait (%p842_p6), %s609_s12, 256  }
  0xdb   : > { %1083 = vsyncadd (%p842_p6), %s609_s12, 4294967040  ;;  %s627_s6 = scalar_lea.sflag [#allocation10], %s599_s17 }
  0xdc   : > { %1085 = dma.done.wait (%p842_p6), %s627_s6, 32  }
  0xdd   : > { %1087 = vsyncadd (%p842_p6), %s627_s6, 4294967264  ;;  %s28_s23 = sadd.s32 1, %s1110_s23   ;;  %s1458_s25 = sld [smem:[#allocation17_spill]] }
  0xde   : > { %p25_p9 = scmp.ge.s32.totalorder %s28_s23, 4   ;;  %s1459_s21 = sld [smem:[#allocation15_spill]] }
  0xdf   : > { %s1460_s22 = sld [smem:[#allocation16_spill]]  ;;  %s1461_s18 = smov %s1094_s19 }
  0xe0   : > { %s1462_s19 = smov %s1098_s20  ;;  %27 = sbr.rel (!%p25_p9) target bundleno = 13 (0xd), region = 129 }
  0xe3   : > { %s1463_s20 = smov %s1458_s25 }
  0xe5   :  { %632 = vsyncpa [#allocation3], 1 }
  0xe6   :  { %634 = vsyncpa [#allocation3 + $0x1], 1 }
  0xe7   :  { %635 = vsyncpa [#allocation4], 1 }
  0xe8   :  { %637 = vsyncpa [#allocation4 + $0x1], 1 }
  0xe9   :  { %638 = vsyncpa [#allocation7], 1 }
  0xea   :  { %640 = vsyncpa [#allocation7 + $0x1], 1 }
  0xeb   :  { %641 = vsyncpa [#allocation10], 1 }
  0xec   :  { %643 = vsyncpa [#allocation10 + $0x1], 1 }

</bundles_post_ra>
